<compile_context>
chip_gen: v5e
topology: v5e:2x2
jax: 0.10.0
libtpu: 0.0.40
codegen_flags: <defaults>
</compile_context>

<pallas_src>
import jax
import jax.numpy as jnp
from jax.experimental import pallas as pl
from jax.experimental.pallas import tpu as pltpu

NOISE_DIM = 2
HIDDEN = 100
OUT_DIM = 2
PAD = 128          # lane-padded hidden width
NEG_SLOPE = 0.01   # PyTorch nn.LeakyReLU default
TB_MAX = 1024      # batch-tile upper bound (per-step overhead ~0.35 us dominates)


def _round_up(x, m):
    return ((x + m - 1) // m) * m


def _leaky_relu(x):
    # Valid for 0 < slope < 1; mul+max (2 VPU ops) vs cmp+select+mul (3 ops).
    return jnp.maximum(x, NEG_SLOPE * x)


def _mlp_kernel(z_ref, w1_ref, b1_ref, w2_ref, b2_ref, w3_ref, b3_ref, o_ref):
    # z tile is narrow (TB, 2): layer 1 as two broadcast-FMAs on the VPU
    # (a contraction of 2 is far too small to be worth an MXU pass).
    z = z_ref[...]                                    # (TB, 2)  f32
    w1 = w1_ref[...]                                  # (2, PAD) f32
    h1 = z[:, 0:1] * w1[0:1, :] + z[:, 1:2] * w1[1:2, :] + b1_ref[...]
    h1 = _leaky_relu(h1)                              # (TB, PAD) f32

    # Layers 2/3: f32 operands, f32 accumulation on the MXU (FLOPs negligible,
    # keeps exact-dtype parity with the f32 PyTorch Generator).
    h2 = jnp.dot(h1, w2_ref[...], preferred_element_type=jnp.float32) + b2_ref[...]
    h2 = _leaky_relu(h2)
    h3 = jnp.dot(h2, w3_ref[...], preferred_element_type=jnp.float32) + b3_ref[...]

    # Narrow (TB, 2) store: 64x less HBM writeback than a PAD-wide output.
    o_ref[...] = h3[:, :OUT_DIM].astype(o_ref.dtype)


def pad_params(params):
    """Pad parameters ONCE (hoisted out of the per-call forward path).

    Weights are stored (in, out) so the kernel computes x @ W + b directly.
    Hidden width 100 is zero-padded to 128 lanes: zero bias lanes, zero weight
    rows/cols and LeakyReLU(0)=0 make the padding mathematically inert.
    """
    w1, b1, w2, b2, w3, b3 = params
    f32 = jnp.float32
    w1p = jnp.zeros((NOISE_DIM, PAD), f32).at[:, :HIDDEN].set(jnp.asarray(w1, f32))
    w2p = jnp.zeros((PAD, PAD), f32).at[:HIDDEN, :HIDDEN].set(jnp.asarray(w2, f32))
    w3p = jnp.zeros((PAD, PAD), f32).at[:HIDDEN, :OUT_DIM].set(jnp.asarray(w3, f32))
    b1p = jnp.zeros((1, PAD), f32).at[0, :HIDDEN].set(jnp.asarray(b1, f32))
    b2p = jnp.zeros((1, PAD), f32).at[0, :HIDDEN].set(jnp.asarray(b2, f32))
    b3p = jnp.zeros((1, PAD), f32).at[0, :OUT_DIM].set(jnp.asarray(b3, f32))
    return (w1p, b1p, w2p, b2p, w3p, b3p)


def _choose_tile(b8, tb_max):
    """Pick the batch tile TB.

    * Few, large grid steps (this kernel is fixed-overhead bound, not
      VMEM/MXU/HBM bound).
    * TB a multiple of 256 when the batch allows (fills 256-row MXU passes on
      v6e/v7x).
    * For b8 >= 512, aim for an even grid >= 2 so the 'parallel' batch axis
      can shard across v7x's two TensorCores; costs at most one extra grid
      step on single-core v5e/v6e.
    """
    tb_max = max(8, _round_up(tb_max, 8))
    if b8 < 512:
        return min(tb_max, b8)
    tb = _round_up(pl.cdiv(b8, 2), 256)   # ~half the batch, MXU-row aligned
    return min(tb, tb_max)


def generator_forward(z, padded_params, *, tb_max=TB_MAX):
    """z: (B, NOISE_DIM) -> (B, OUT_DIM) float32. `padded_params` from pad_params."""
    w1p, b1p, w2p, b2p, w3p, b3p = padded_params
    B = z.shape[0]
    b8 = _round_up(B, 8)                  # sublane-align the batch
    TB = _choose_tile(b8, tb_max)         # batch tile (multiple of 8)
    Bp = pl.cdiv(b8, TB) * TB             # padded batch (multiple of TB)
    grid = Bp // TB

    z_p = z.astype(jnp.float32)
    if Bp != B:
        z_p = jnp.pad(z_p, ((0, Bp - B), (0, 0)))

    # Advisory cost for XLA's scheduler: tiny, latency-bound custom call.
    flops = 2 * Bp * (NOISE_DIM * PAD + PAD * PAD + PAD * PAD)
    bytes_accessed = (Bp * (NOISE_DIM + OUT_DIM) * 4
                      + (NOISE_DIM * PAD + 2 * PAD * PAD + 3 * PAD) * 4)

    const = lambda i: (0, 0)
    out = pl.pallas_call(
        _mlp_kernel,
        out_shape=jax.ShapeDtypeStruct((Bp, OUT_DIM), jnp.float32),
        grid_spec=pltpu.PrefetchScalarGridSpec(
            num_scalar_prefetch=0,
            grid=(grid,),
            in_specs=[
                pl.BlockSpec((TB, NOISE_DIM), lambda i: (i, 0)),  # z tile (narrow)
                pl.BlockSpec((NOISE_DIM, PAD), const),            # W1 (tiny)
                pl.BlockSpec((1, PAD), const),                    # b1
                pl.BlockSpec((PAD, PAD), const),                  # W2
                pl.BlockSpec((1, PAD), const),                    # b2
                pl.BlockSpec((PAD, PAD), const),                  # W3
                pl.BlockSpec((1, PAD), const),                    # b3
            ],
            out_specs=pl.BlockSpec((TB, OUT_DIM), lambda i: (i, 0)),
        ),
        compiler_params=pltpu.CompilerParams(
            dimension_semantics=("parallel",),          # batch tiles independent
            vmem_limit_bytes=32 * 1024 * 1024),         # headroom vs v5e's 16 MiB default
        cost_estimate=pl.CostEstimate(
            flops=flops, transcendentals=0, bytes_accessed=bytes_accessed),
    )(z_p, w1p, b1p, w2p, b2p, w3p, b3p)

    return out if Bp == B else out[:B]


def init_params(key):
    """Deterministic init matching nn.Linear shapes (weights kept (in, out)).

    Uniform(-1/sqrt(fan_in), 1/sqrt(fan_in)), as in PyTorch's default init.
    """
    k1, k2, k3, k4, k5, k6 = jax.random.split(key, 6)

    def uni(k, shape, fan_in):
        lim = 1.0 / jnp.sqrt(jnp.float32(fan_in))
        return jax.random.uniform(k, shape, jnp.float32, -lim, lim)

    w1 = uni(k1, (NOISE_DIM, HIDDEN), NOISE_DIM)
    b1 = uni(k2, (HIDDEN,), NOISE_DIM)
    w2 = uni(k3, (HIDDEN, HIDDEN), HIDDEN)
    b2 = uni(k4, (HIDDEN,), HIDDEN)
    w3 = uni(k5, (HIDDEN, OUT_DIM), HIDDEN)
    b3 = uni(k6, (OUT_DIM,), HIDDEN)
    return (w1, b1, w2, b2, w3, b3)


def _reference_forward(z, params):
    """Pure f32 reference of the PyTorch Generator (no kernel-mirroring casts)."""
    w1, b1, w2, b2, w3, b3 = params
    hp = jax.lax.Precision.HIGHEST
    h = jnp.dot(z.astype(jnp.float32), w1, precision=hp) + b1
    h = jnp.where(h > 0, h, NEG_SLOPE * h)
    h = jnp.dot(h, w2, precision=hp) + b2
    h = jnp.where(h > 0, h, NEG_SLOPE * h)
    h = jnp.dot(h, w3, precision=hp) + b3
    return h


if __name__ == "__main__":
    key = jax.random.PRNGKey(0)
    pkey, zk1, zk2, zk3 = jax.random.split(key, 4)
    params = init_params(pkey)
    pparams = pad_params(params)   # hoisted: pad once, reuse every forward

    # 1) Tiny batch (padding 5 -> 8, single grid step).
    z_small = jax.random.normal(zk1, (5, NOISE_DIM), dtype=jnp.float32)
    out_small = jax.block_until_ready(generator_forward(z_small, pparams))
    assert out_small.shape == (5, OUT_DIM)
    assert jnp.allclose(out_small, _reference_forward(z_small, params),
                        atol=2e-2, rtol=2e-2), "small-batch mismatch vs reference"

    # 2) b8 >= 512 path: TB=512, Bp=1024, grid=2 on the 'parallel' axis
    #    (both v7x TensorCores get a tile; padding rows are inert zeros).
    z_big = jax.random.normal(zk2, (600, NOISE_DIM), dtype=jnp.float32)
    out_big = jax.block_until_ready(generator_forward(z_big, pparams))
    assert out_big.shape == (600, OUT_DIM)
    assert jnp.allclose(out_big, _reference_forward(z_big, params),
                        atol=2e-2, rtol=2e-2), "split-grid batch mismatch vs reference"

    # 3) Forced small tile: grid=3 with ragged tail (300 -> 384).
    z_mid = jax.random.normal(zk3, (300, NOISE_DIM), dtype=jnp.float32)
    out_mid = jax.block_until_ready(generator_forward(z_mid, pparams, tb_max=128))
    assert out_mid.shape == (300, OUT_DIM)
    assert jnp.allclose(out_mid, _reference_forward(z_mid, params),
                        atol=2e-2, rtol=2e-2), "multi-tile batch mismatch vs reference"

    print("KERNEL_OK")
</pallas_src>

<mosaic_0001>
module attributes {stable_mosaic.version = 11 : i64} {
  func.func @_mlp_kernel(%arg0: i32, %arg1: memref<8x2xf32, #tpu.memory_space<vmem>>, %arg2: memref<2x128xf32, #tpu.memory_space<vmem>>, %arg3: memref<1x128xf32, #tpu.memory_space<vmem>>, %arg4: memref<128x128xf32, #tpu.memory_space<vmem>>, %arg5: memref<1x128xf32, #tpu.memory_space<vmem>>, %arg6: memref<128x128xf32, #tpu.memory_space<vmem>>, %arg7: memref<1x128xf32, #tpu.memory_space<vmem>>, %arg8: memref<8x2xf32, #tpu.memory_space<vmem>>) attributes {dimension_semantics = [#tpu.dimension_semantics<parallel>], iteration_bounds = array<i64: 1>, scalar_prefetch = 0 : i64, scratch_operands = 0 : i64, tpu.core_type = #tpu.core_type<tc>, window_params = [{transform_indices = @transform_0, window_bounds = array<i64: 8, 2>}, {pipeline_mode = #tpu.pipeline_mode<synchronous>, transform_indices = @transform_1, window_bounds = array<i64: 2, 128>}, {pipeline_mode = #tpu.pipeline_mode<synchronous>, transform_indices = @transform_2, window_bounds = array<i64: 1, 128>}, {pipeline_mode = #tpu.pipeline_mode<synchronous>, transform_indices = @transform_3, window_bounds = array<i64: 128, 128>}, {pipeline_mode = #tpu.pipeline_mode<synchronous>, transform_indices = @transform_4, window_bounds = array<i64: 1, 128>}, {pipeline_mode = #tpu.pipeline_mode<synchronous>, transform_indices = @transform_5, window_bounds = array<i64: 128, 128>}, {pipeline_mode = #tpu.pipeline_mode<synchronous>, transform_indices = @transform_6, window_bounds = array<i64: 1, 128>}, {transform_indices = @transform_7, window_bounds = array<i64: 8, 2>}]} {
    %c0 = arith.constant 0 : index
    %c0_0 = arith.constant 0 : index
    %0 = vector.load %arg1[%c0, %c0_0] : memref<8x2xf32, #tpu.memory_space<vmem>>, vector<8x2xf32>
    %c0_1 = arith.constant 0 : index
    %c0_2 = arith.constant 0 : index
    %1 = vector.load %arg2[%c0_1, %c0_2] : memref<2x128xf32, #tpu.memory_space<vmem>>, vector<2x128xf32>
    %2 = vector.extract_strided_slice %0 {offsets = [0, 0], sizes = [8, 1], strides = [1, 1]} : vector<8x2xf32> to vector<8x1xf32>
    %3 = vector.extract_strided_slice %1 {offsets = [0, 0], sizes = [1, 128], strides = [1, 1]} : vector<2x128xf32> to vector<1x128xf32>
    %4 = vector.broadcast %2 : vector<8x1xf32> to vector<8x128xf32>
    %5 = vector.broadcast %3 : vector<1x128xf32> to vector<8x128xf32>
    %6 = arith.mulf %4, %5 : vector<8x128xf32>
    %7 = vector.extract_strided_slice %0 {offsets = [0, 1], sizes = [8, 1], strides = [1, 1]} : vector<8x2xf32> to vector<8x1xf32>
    %8 = vector.extract_strided_slice %1 {offsets = [1, 0], sizes = [1, 128], strides = [1, 1]} : vector<2x128xf32> to vector<1x128xf32>
    %9 = vector.broadcast %7 : vector<8x1xf32> to vector<8x128xf32>
    %10 = vector.broadcast %8 : vector<1x128xf32> to vector<8x128xf32>
    %11 = arith.mulf %9, %10 : vector<8x128xf32>
    %12 = arith.addf %6, %11 : vector<8x128xf32>
    %c0_3 = arith.constant 0 : index
    %c0_4 = arith.constant 0 : index
    %13 = vector.load %arg3[%c0_3, %c0_4] : memref<1x128xf32, #tpu.memory_space<vmem>>, vector<1x128xf32>
    %14 = vector.broadcast %13 : vector<1x128xf32> to vector<8x128xf32>
    %15 = arith.addf %12, %14 : vector<8x128xf32>
    %cst = arith.constant 0.00999999977 : f32
    %16 = vector.broadcast %cst : f32 to vector<8x128xf32>
    %17 = arith.mulf %16, %15 : vector<8x128xf32>
    %18 = arith.maximumf %15, %17 : vector<8x128xf32>
    %c0_5 = arith.constant 0 : index
    %c0_6 = arith.constant 0 : index
    %19 = vector.load %arg4[%c0_5, %c0_6] : memref<128x128xf32, #tpu.memory_space<vmem>>, vector<128x128xf32>
    %cst_7 = arith.constant dense<0.000000e+00> : vector<8x128xf32>
    %20 = tpu.matmul %18, %19, %cst_7 {dimension_numbers = #tpu.dot_dimension_numbers<[1], [0], [0], [1], [0, 0, 1, 1], [], []>} : vector<8x128xf32>, vector<128x128xf32>, vector<8x128xf32> -> vector<8x128xf32>
    %c0_8 = arith.constant 0 : index
    %c0_9 = arith.constant 0 : index
    %21 = vector.load %arg5[%c0_8, %c0_9] : memref<1x128xf32, #tpu.memory_space<vmem>>, vector<1x128xf32>
    %22 = vector.broadcast %21 : vector<1x128xf32> to vector<8x128xf32>
    %23 = arith.addf %20, %22 : vector<8x128xf32>
    %cst_10 = arith.constant 0.00999999977 : f32
    %24 = vector.broadcast %cst_10 : f32 to vector<8x128xf32>
    %25 = arith.mulf %24, %23 : vector<8x128xf32>
    %26 = arith.maximumf %23, %25 : vector<8x128xf32>
    %c0_11 = arith.constant 0 : index
    %c0_12 = arith.constant 0 : index
    %27 = vector.load %arg6[%c0_11, %c0_12] : memref<128x128xf32, #tpu.memory_space<vmem>>, vector<128x128xf32>
    %cst_13 = arith.constant dense<0.000000e+00> : vector<8x128xf32>
    %28 = tpu.matmul %26, %27, %cst_13 {dimension_numbers = #tpu.dot_dimension_numbers<[1], [0], [0], [1], [0, 0, 1, 1], [], []>} : vector<8x128xf32>, vector<128x128xf32>, vector<8x128xf32> -> vector<8x128xf32>
    %c0_14 = arith.constant 0 : index
    %c0_15 = arith.constant 0 : index
    %29 = vector.load %arg7[%c0_14, %c0_15] : memref<1x128xf32, #tpu.memory_space<vmem>>, vector<1x128xf32>
    %30 = vector.broadcast %29 : vector<1x128xf32> to vector<8x128xf32>
    %31 = arith.addf %28, %30 : vector<8x128xf32>
    %32 = vector.extract_strided_slice %31 {offsets = [0, 0], sizes = [8, 2], strides = [1, 1]} : vector<8x128xf32> to vector<8x2xf32>
    %c0_16 = arith.constant 0 : index
    %c0_17 = arith.constant 0 : index
    %33 = vector.load %arg8[%c0_16, %c0_17] : memref<8x2xf32, #tpu.memory_space<vmem>>, vector<8x2xf32>
    tpu.vector_store %arg8[%c0_16, %c0_17], %32 {strides = array<i32>} : memref<8x2xf32, #tpu.memory_space<vmem>>, vector<8x2xf32>,
    return
  }
  func.func @transform_0(%arg0: i32) -> (i32, i32) {
    %c0_i32 = arith.constant 0 : i32
    %c0_i32_0 = arith.constant 0 : i32
    return %arg0, %c0_i32 : i32, i32
  }
  func.func @transform_1(%arg0: i32) -> (i32, i32) {
    %c0_i32 = arith.constant 0 : i32
    %c0_i32_0 = arith.constant 0 : i32
    %c0_i32_1 = arith.constant 0 : i32
    return %c0_i32, %c0_i32_0 : i32, i32
  }
  func.func @transform_2(%arg0: i32) -> (i32, i32) {
    %c0_i32 = arith.constant 0 : i32
    %c0_i32_0 = arith.constant 0 : i32
    %c0_i32_1 = arith.constant 0 : i32
    return %c0_i32, %c0_i32_0 : i32, i32
  }
  func.func @transform_3(%arg0: i32) -> (i32, i32) {
    %c0_i32 = arith.constant 0 : i32
    %c0_i32_0 = arith.constant 0 : i32
    %c0_i32_1 = arith.constant 0 : i32
    return %c0_i32, %c0_i32_0 : i32, i32
  }
  func.func @transform_4(%arg0: i32) -> (i32, i32) {
    %c0_i32 = arith.constant 0 : i32
    %c0_i32_0 = arith.constant 0 : i32
    %c0_i32_1 = arith.constant 0 : i32
    return %c0_i32, %c0_i32_0 : i32, i32
  }
  func.func @transform_5(%arg0: i32) -> (i32, i32) {
    %c0_i32 = arith.constant 0 : i32
    %c0_i32_0 = arith.constant 0 : i32
    %c0_i32_1 = arith.constant 0 : i32
    return %c0_i32, %c0_i32_0 : i32, i32
  }
  func.func @transform_6(%arg0: i32) -> (i32, i32) {
    %c0_i32 = arith.constant 0 : i32
    %c0_i32_0 = arith.constant 0 : i32
    %c0_i32_1 = arith.constant 0 : i32
    return %c0_i32, %c0_i32_0 : i32, i32
  }
  func.func @transform_7(%arg0: i32) -> (i32, i32) {
    %c0_i32 = arith.constant 0 : i32
    %c0_i32_0 = arith.constant 0 : i32
    return %arg0, %c0_i32 : i32, i32
  }
}

</mosaic_0001>

<bundles_post_ra>
// kernel: tpu_custom_call.1
= control target key start
LH: loop header
LB: loop body
LE: loop exit
PB: predicated region body
PF: predicated region fallthrough
CT: control target
= control target key end

     0   :  { %12 = vsyncpa [#allocation3], 0  ;;  %s304_s0 = inlined_call_operand.vmem [shape: f32[8,2], index: 0, kind: input, shape index: {}]   ;;  %s305_s1 = inlined_call_operand.vmem [shape: f32[2,128], index: 1, kind: input, shape index: {}]   ;;  %s306_s2 = inlined_call_operand.vmem [shape: f32[1,128], index: 2, kind: input, shape index: {}]   ;;  %s307_s3 = inlined_call_operand.hbm [shape: f32[128,128], index: 3, kind: input, shape index: {}]   ;;  %s308_s4 = inlined_call_operand.vmem [shape: f32[1,128], index: 4, kind: input, shape index: {}]   ;;  %s309_s5 = inlined_call_operand.hbm [shape: f32[128,128], index: 5, kind: input, shape index: {}]   ;;  %s310_s6 = inlined_call_operand.vmem [shape: f32[1,128], index: 6, kind: input, shape index: {}]   ;;  %s311_s7 = inlined_call_operand.vmem [shape: f32[8,2], index: 7, kind: output, shape index: {}]  }
   0x1   :  { %s24_s26 = sshll.u32 %s307_s3, 4  ;;  %s25_s26 = int_to_ptr.hbm [resolvable:$true] %s24_s26 }
   0x2   :  { %13 = vsyncpa [#allocation5], 0  ;;  %s234_s27 = smov [#allocation2]   ;;  %s39_s8 = sshll.u32 %s309_s5, 4  ;;  %s40_s8 = int_to_ptr.hbm [resolvable:$true] %s39_s8 }
   0x3   :  { %s26_s28 = sshll.u32 %s234_s27, 4  ;;  %s235_s9 = smov 128   ;;  %s27_s28 = int_to_ptr.vmem [resolvable:$true] %s26_s28 }
   0x4   :  { %s236_s10 = smov 8   ;;  %s237_s11 = smov [#allocation4]  }
   0x5   :  { %32 = dma.hbm_to_vmem [thread:$0]  %s25_s26, 2048, %s27_s28, [#allocation3], %s235_s9, %s235_s9, %s236_s10  }
   0x6   :  { %s41_s12 = sshll.u32 %s237_s11, 4  ;;  %s42_s12 = int_to_ptr.vmem [resolvable:$true] %s41_s12 }
   0x7   :  { %47 = dma.hbm_to_vmem [thread:$0]  %s40_s8, 2048, %s42_s12, [#allocation5], %s235_s9, %s235_s9, %s236_s10  }
   0x8   :  { %230 = dma.done.wait [#allocation3], 2048  }
   0x9   :  { %231 = vsyncadd [#allocation3], 4294965248 }
   0xa   :  { %232 = dma.done.wait [#allocation5], 2048  }
   0xb   :  { %233 = vsyncadd [#allocation5], 4294965248  ;;  %v238_v0 = vmov 0   ;;  %v58_v1 = vld [vmem:[%s304_s0] sm:$0xff]  ;;  %v96_v2 = vld [vmem:[#allocation2 + $0x78] sm:$0xff]  ;;  %v239_v8 = vmov 1  }
   0xc   :  { %177 = vset.pattern.permute.xlu0 %v238_v0  ;;  %v95_v3 = vld [vmem:[#allocation2 + $0x70] sm:$0xff]  ;;  %101 = vmatpush.msra.mxu0 %v96_v2  ;;  %v94_v4 = vld [vmem:[#allocation2 + $0x68] sm:$0xff]  ;;  %v93_v5 = vld [vmem:[#allocation2 + $0x60] sm:$0xff]  ;;  %vm163_vm0 = vcmask 15360  }
   0xd   :  { %62 = vperm.xlu0 %177, %v58_v1   ;;  %v92_v6 = vld [vmem:[#allocation2 + $0x58] sm:$0xff]  ;;  %v91_v7 = vld [vmem:[#allocation2 + $0x50] sm:$0xff]  ;;  %v90_v9 = vld [vmem:[#allocation2 + $0x48] sm:$0xff] }
   0xe   :  { %102 = vmatpush.msra.mxu0 %v95_v3  ;;  %v89_v10 = vld [vmem:[#allocation2 + $0x40] sm:$0xff]  ;;  %v88_v11 = vld [vmem:[#allocation2 + $0x38] sm:$0xff]  ;;  %v87_v12 = vld [vmem:[#allocation2 + $0x30] sm:$0xff] }
   0xf   :  { %v86_v13 = vld [vmem:[#allocation2 + $0x28] sm:$0xff]  ;;  %v85_v14 = vld [vmem:[#allocation2 + $0x20] sm:$0xff]  ;;  %v84_v15 = vld [vmem:[#allocation2 + $0x18] sm:$0xff] }
  0x10   :  { %103 = vmatpush.msra.mxu0 %v94_v4  ;;  %v83_v16 = vld [vmem:[#allocation2 + $0x10] sm:$0xff]  ;;  %v82_v17 = vld [vmem:[#allocation2 + $0x8] sm:$0xff]  ;;  %v81_v18 = vld [vmem:[#allocation2] sm:$0xff] }
  0x11   :  { %v138_v19 = vld [vmem:[#allocation4 + $0x78] sm:$0xff]  ;;  %v137_v20 = vld [vmem:[#allocation4 + $0x70] sm:$0xff]  ;;  %v136_v21 = vld [vmem:[#allocation4 + $0x68] sm:$0xff] }
  0x12   :  { %104 = vmatpush.msra.mxu0 %v93_v5  ;;  %143 = vmatpush.msra.mxu1 %v138_v19  ;;  %v135_v22 = vld [vmem:[#allocation4 + $0x60] sm:$0xff]  ;;  %v134_v23 = vld [vmem:[#allocation4 + $0x58] sm:$0xff]  ;;  %v133_v24 = vld [vmem:[#allocation4 + $0x50] sm:$0xff] }
  0x13   :  { %v132_v25 = vld [vmem:[#allocation4 + $0x48] sm:$0xff]  ;;  %v131_v27 = vld [vmem:[#allocation4 + $0x40] sm:$0xff]  ;;  %v130_v28 = vld [vmem:[#allocation4 + $0x38] sm:$0xff] }
  0x14   :  { %105 = vmatpush.msra.mxu0 %v92_v6  ;;  %144 = vmatpush.msra.mxu1 %v137_v20  ;;  %v59_v29 = vld [vmem:[%s305_s1] sm:$0x3]  ;;  %v129_v30 = vld [vmem:[#allocation4 + $0x30] sm:$0xff]  ;;  %v128_v33 = vld [vmem:[#allocation4 + $0x28] sm:$0xff] }
  0x15   :  { %178 = vset.pattern.permute.xlu0 %v239_v8  ;;  %v65_v31 = vperm.slane %v59_v29, 0  ;;  %v71_v32 = vperm.slane %v59_v29, 1  ;;  %v127_v34 = vld [vmem:[#allocation4 + $0x20] sm:$0xff]  ;;  %v126_v43 = vld [vmem:[#allocation4 + $0x18] sm:$0xff]  ;;  %v125_v44 = vld [vmem:[#allocation4 + $0x10] sm:$0xff] }
  0x16   :  { %68 = vperm.xlu0 %178, %v58_v1   ;;  %106 = vmatpush.msra.mxu0 %v91_v7  ;;  %v179_v38 = vld [vmem:[%s306_s2] ss:$0 sm:$0xff]  ;;  %v124_v45 = vld [vmem:[#allocation4 + $0x8] sm:$0xff] }
  0x17   :  { %145 = vmatpush.msra.mxu1 %v136_v21  ;;  %v123_v46 = vld [vmem:[#allocation4] sm:$0xff] }
  0x18   :  { %107 = vmatpush.msra.mxu0 %v90_v9  ;;  %v180_v47 = vld [vmem:[%s308_s4] ss:$0 sm:$0xff] }
  0x19   :  { %146 = vmatpush.msra.mxu1 %v135_v22  ;;  %v181_v52 = vld [vmem:[%s310_s6] ss:$0 sm:$0xff] }
  0x1a   :  { %108 = vmatpush.msra.mxu0 %v89_v10 }
  0x1b   :  { %147 = vmatpush.msra.mxu1 %v134_v23 }
  0x1c   :  { %109 = vmatpush.msra.mxu0 %v88_v11 }
  0x1d   :  { %148 = vmatpush.msra.mxu1 %v133_v24 }
  0x1e   :  { %110 = vmatpush.msra.mxu0 %v87_v12 }
  0x1f   :  { %149 = vmatpush.msra.mxu1 %v132_v25 }
  0x20   :  { %111 = vmatpush.msra.mxu0 %v86_v13 }
  0x21   :  { %150 = vmatpush.msra.mxu1 %v131_v27 }
  0x22   :  { %112 = vmatpush.msra.mxu0 %v85_v14 }
  0x23   :  { %151 = vmatpush.msra.mxu1 %v130_v28 }
  0x24   :  { %113 = vmatpush.msra.mxu0 %v84_v15 }
  0x25   :  { %152 = vmatpush.msra.mxu1 %v129_v30 }
  0x26   :  { %114 = vmatpush.msra.mxu0 %v83_v16 }
  0x27   :  { %153 = vmatpush.msra.mxu1 %v128_v33 }
  0x28   :  { %115 = vmatpush.msra.mxu0 %v82_v17 }
  0x29   :  { %154 = vmatpush.msra.mxu1 %v127_v34 }
  0x2a   :  { %116 = vmatpush.msra.mxu0 %v81_v18 }
  0x2b   :  { %155 = vmatpush.msra.mxu1 %v126_v43 }
  0x2d   :  { %156 = vmatpush.msra.mxu1 %v125_v44 }
  0x2f   :  { %157 = vmatpush.msra.mxu1 %v124_v45 }
  0x31   :  { %158 = vmatpush.msra.mxu1 %v123_v46 }
  0x7f   :  { %v63_v26 = vpop.permute.xlu0 %62 }
  0x80   :  { %v66_v36 = vmul.f32 %v65_v31, %v63_v26 }
  0x88   :  { %v69_v35 = vpop.permute.xlu0 %68 }
  0x89   :  { %v72_v37 = vmul.f32 %v71_v32, %v69_v35 }
  0x8b   :  { %v73_v39 = vadd.f32 %v72_v37, %v66_v36 }
  0x8d   :  { %v78_v40 = vadd.f32 %v179_v38, %v73_v39 }
  0x8f   :  { %v79_v41 = vmul.f32 0.01, %v78_v40 }
  0x91   :  { %v80_v42 = vmax.f32 %v78_v40, %v79_v41 }
  0x93   :  { %117 = vmatmul.f32.vlgmr.msra.gmra.mxu0 %v80_v42 }
 0x110   :  { %v118_v48 = vpop.f32.mrf.mxu0 }
 0x111   :  { %v119_v49 = vadd.f32 %v180_v47, %v118_v48 }
 0x113   :  { %v121_v50 = vmul.f32 0.01, %v119_v49 }
 0x115   :  { %v122_v51 = vmax.f32 %v119_v49, %v121_v50 }
 0x117   :  { %159 = vmatmul.f32.vlgmr.msra.gmra.mxu1 %v122_v51 }
 0x194   :  { %v160_v53 = vpop.f32.mrf.mxu1 }
 0x195   :  { %v161_v54 = vadd.f32 %v181_v52, %v160_v53 }
 0x197   :  { %164 = vst.msk [vmem:[%s311_s7] sm:$0xff] %vm163_vm0, %v161_v54 }
 0x198   :  { %169 = vsyncpa [#allocation3], 1 }
 0x199   :  { %170 = vsyncpa [#allocation5], 1 }

</bundles_post_ra>
